<compile_context>
chip_gen: v7x
topology: tpu7x:2x2x1
jax: 0.10.0
libtpu: 0.0.40
codegen_flags: <defaults>
</compile_context>

<pallas_src>
import numpy as np
import jax
import jax.numpy as jnp
from jax import lax
from jax.experimental import pallas as pl
from jax.experimental.pallas import tpu as pltpu

EPS = 1e-5          # BatchNorm2d / InstanceNorm2d default eps
NEG_SLOPE = 0.01    # LeakyReLU default negative_slope
SP = 4              # Selector.spatial_attention


def _lane_tile(L, cap=2048):
    """Largest multiple-of-128 tile <= cap that divides L (or L itself)."""
    if L % 128 != 0:
        return L
    t = min(L, cap)
    t -= t % 128
    while L % t != 0:
        t -= 128
    return t


# ---------------------------------------------------------------------------
# Kernels
# ---------------------------------------------------------------------------
def _stats_kernel(x_ref, sum_ref, sq_ref):
    # One-pass sum / sum-of-squares per (b, c) row, accumulated over lane tiles.
    @pl.when(pl.program_id(0) == 0)
    def _init():
        sum_ref[...] = jnp.zeros_like(sum_ref)
        sq_ref[...] = jnp.zeros_like(sq_ref)

    xb = x_ref[...]                                   # (B*Cin, tl)
    sum_ref[...] += jnp.sum(xb, axis=1, keepdims=True)
    sq_ref[...] += jnp.sum(xb * xb, axis=1, keepdims=True)


def _make_fused_kernel(*, ksize, pad, H, W, cin, cout, pad_l, width, first,
                       conv_dtype):
    HW = H * W
    K = cin * ksize * ksize

    def kernel(*refs):
        if first:
            (x_ref, w_ref, b_ref, mask_ref, pmatb_ref, selm_ref, umatb_ref,
             wfc_ref, wa1_ref, ba1_ref, wa2_ref, ba2_ref,
             out_ref, fpad_ref, patch_ref) = refs
            spad_ref = None
        else:
            (x_ref, bn_a_ref, bn_b_ref, in_a_ref, in_b_ref,
             w_ref, b_ref, mask_ref, pmatb_ref, selm_ref, umatb_ref,
             wfc_ref, wa1_ref, ba1_ref, wa2_ref, ba2_ref,
             out_ref, fpad_ref, spad_ref, patch_ref) = refs

        x = x_ref[...]                                # (Cin, HW) f32
        if first:
            f = x
            s = None
        else:
            f = x * bn_a_ref[...] + bn_b_ref[...]     # BatchNorm (batch stats)
            f = jnp.where(f > 0, f, NEG_SLOPE * f)    # LeakyReLU
            s = x * in_a_ref[...] + in_b_ref[...]     # InstanceNorm
            s = jnp.where(s > 0, s, NEG_SLOPE * s)

        # Zero only the halo strips (tiny); interior fully overwritten below.
        if pad_l > 0:
            zl = jnp.zeros((cin, pad_l), jnp.float32)
            fpad_ref[:, 0:pad_l] = zl
            fpad_ref[:, pad_l + HW:width] = zl
            if not first:
                spad_ref[:, 0:pad_l] = zl
                spad_ref[:, pad_l + HW:width] = zl
        fpad_ref[:, pad_l:pad_l + HW] = f
        if not first:
            spad_ref[:, pad_l:pad_l + HW] = s

        # In-VMEM im2col into one patch scratch (f taps then s taps), bf16.
        t = 0
        for di in range(ksize):
            for dj in range(ksize):
                off = pad_l + (di - pad) * W + (dj - pad)   # static offset
                m = mask_ref[t:t + 1, :]                    # (1, HW) host-const
                patch_ref[t * cin:(t + 1) * cin, :] = (
                    fpad_ref[:, off:off + HW] * m).astype(conv_dtype)
                if not first:
                    patch_ref[K + t * cin:K + (t + 1) * cin, :] = (
                        spad_ref[:, off:off + HW] * m).astype(conv_dtype)
                t += 1

        # Both convs as ONE block-diagonal (stacked when first) MXU matmul.
        o12 = jnp.dot(w_ref[...], patch_ref[...],
                      preferred_element_type=jnp.float32) + b_ref[...]
        o1 = o12[0:cout, :]                           # (Cout, HW)
        o2 = o12[cout:2 * cout, :]

        # Selector (per image): 4x4 adaptive avg-pool -> fc -> heads -> softmax.
        selm = selm_ref[...]                          # (Cout, Cout*16) 0/1 mask
        pooled_t = jnp.dot(o1 + o2, pmatb_ref[...],
                           preferred_element_type=jnp.float32)   # (Cout, in_ch)
        pooled_flat = jnp.sum(pooled_t * selm, axis=0, keepdims=True)  # (1,in_ch)
        y = jnp.maximum(jnp.dot(pooled_flat, wfc_ref[...],
                                preferred_element_type=jnp.float32), 0.0)
        a1 = jnp.dot(y, wa1_ref[...],
                     preferred_element_type=jnp.float32) + ba1_ref[...]
        a2 = jnp.dot(y, wa2_ref[...],
                     preferred_element_type=jnp.float32) + ba2_ref[...]
        mx = jnp.maximum(a1, a2)
        e1 = jnp.exp(a1 - mx)
        e2 = jnp.exp(a2 - mx)
        inv = pl.reciprocal(e1 + e2, approx=True)     # EUP, free slot
        att1 = (e1 * inv) * selm                      # (Cout, in_ch)
        att2 = (e2 * inv) * selm

        # Nearest-neighbour 4x4 -> HxW upsample + weighted combine (lane-dense).
        up1 = jnp.dot(att1, umatb_ref[...], preferred_element_type=jnp.float32)
        up2 = jnp.dot(att2, umatb_ref[...], preferred_element_type=jnp.float32)
        out_ref[...] = o1 * up1 + o2 * up2

    return kernel


# ---------------------------------------------------------------------------
# One-time parameter preparation (hoisted out of the forward)
# ---------------------------------------------------------------------------
def prepare_selective_conv_params(params, *, ksize, pad, H, W, first):
    Cout, Cin = params["w1"].shape[:2]
    HW = H * W
    K = Cin * ksize * ksize
    kk = ksize * ksize
    in_ch = Cout * SP * SP
    bh, bw = H // SP, W // SP

    # bf16 conv matmul operands when channel packing is clean; f32 fallback.
    conv_dtype = jnp.bfloat16 if (Cin % 2 == 0) else jnp.float32

    # Conv weights reordered to tap-major (t*Cin + c) to match the patch layout.
    w1m = jnp.transpose(params["w1"], (0, 2, 3, 1)).reshape(Cout, K).astype(jnp.float32)
    w2m = jnp.transpose(params["w2"], (0, 2, 3, 1)).reshape(Cout, K).astype(jnp.float32)
    if first:
        w_cat = jnp.concatenate([w1m, w2m], axis=0)               # (2*Cout, K)
    else:
        z = jnp.zeros((Cout, K), jnp.float32)
        w_cat = jnp.concatenate(
            [jnp.concatenate([w1m, z], axis=1),
             jnp.concatenate([z, w2m], axis=1)], axis=0)          # (2*Cout, 2*K)
    w_cat = w_cat.astype(conv_dtype)
    b12 = jnp.concatenate([params["b1"], params["b2"]]).reshape(
        2 * Cout, 1).astype(jnp.float32)

    # Host-precomputed k*k border masks (handles image borders for every tap).
    hh = np.arange(H)[:, None]
    ww = np.arange(W)[None, :]
    masks = np.zeros((kk, HW), np.float32)
    t = 0
    for di in range(ksize):
        for dj in range(ksize):
            hp = hh + (di - pad)
            wp = ww + (dj - pad)
            m = ((hp >= 0) & (hp < H) & (wp >= 0) & (wp < W)).astype(np.float32)
            masks[t] = m.reshape(-1)
            t += 1

    # 4x4 adaptive-avg-pool / nearest-upsample matrices, tiled along the
    # flattened (c*16 + cell) axis so the selector works on (1, Cout*16) rows.
    hs = np.arange(H) // bh
    ws = np.arange(W) // bw
    cell = (hs[:, None] * SP + ws[None, :]).reshape(-1)           # (HW,)
    ind = np.zeros((HW, SP * SP), np.float32)
    ind[np.arange(HW), cell] = 1.0
    pmat_big = np.tile(ind / float(bh * bw), (1, Cout))           # (HW, in_ch)
    umat_big = np.tile(ind.T, (Cout, 1))                          # (in_ch, HW)
    sel_mask = np.zeros((Cout, in_ch), np.float32)
    for c in range(Cout):
        sel_mask[c, c * SP * SP:(c + 1) * SP * SP] = 1.0

    return dict(
        conv_dtype=conv_dtype,
        w_cat=w_cat, b12=b12,
        masks=jnp.asarray(masks),
        pmat_big=jnp.asarray(pmat_big),
        umat_big=jnp.asarray(umat_big),
        sel_mask=jnp.asarray(sel_mask),
        wfc_T=params["w_fc"].T.astype(jnp.float32),
        wa1_T=params["w_a1"].T.astype(jnp.float32),
        ba1=params["b_a1"].reshape(1, in_ch).astype(jnp.float32),
        wa2_T=params["w_a2"].T.astype(jnp.float32),
        ba2=params["b_a2"].reshape(1, in_ch).astype(jnp.float32),
    )


# ---------------------------------------------------------------------------
# Wrapper
# ---------------------------------------------------------------------------
def selective_conv_forward(x, params, *, ksize, pad, first=False, prepared=None):
    B, Cin, H, W = x.shape
    Cout = params["w1"].shape[0]
    HW = H * W
    K = Cin * ksize * ksize
    kk = ksize * ksize
    in_ch = Cout * SP * SP
    hidden = params["w_fc"].shape[0]
    assert H % SP == 0 and W % SP == 0

    if prepared is None:
        prepared = prepare_selective_conv_params(
            params, ksize=ksize, pad=pad, H=H, W=W, first=first)
    conv_dtype = prepared["conv_dtype"]

    halo = pad * W + pad
    pad_l = ((halo + 127) // 128) * 128 if halo > 0 else 0
    width = (pad_l + HW + pad_l) if pad_l > 0 else HW

    x3 = x.reshape(B, Cin, HW).astype(jnp.float32)

    # ---- BN / IN statistics (training-mode batch stats, no affine) ---------
    if not first:
        x2 = x3.reshape(B * Cin, HW)
        tl = _lane_tile(HW)
        rsum, rsq = pl.pallas_call(
            _stats_kernel,
            out_shape=(jax.ShapeDtypeStruct((B * Cin, 1), jnp.float32),
                       jax.ShapeDtypeStruct((B * Cin, 1), jnp.float32)),
            grid=(HW // tl,),
            in_specs=[pl.BlockSpec((B * Cin, tl), lambda l: (0, l))],
            out_specs=(pl.BlockSpec((B * Cin, 1), lambda l: (0, 0)),
                       pl.BlockSpec((B * Cin, 1), lambda l: (0, 0))),
            compiler_params=pltpu.CompilerParams(
                dimension_semantics=("arbitrary",)),
        )(x2)
        n_sp = float(HW)
        rmean = rsum / n_sp
        var_i = jnp.maximum(rsq / n_sp - rmean * rmean, 0.0)
        inv_i = lax.rsqrt(var_i + EPS)
        in_a = inv_i.reshape(B, Cin, 1)
        in_b = (-rmean * inv_i).reshape(B, Cin, 1)
        csum = rsum.reshape(B, Cin).sum(axis=0)
        csq = rsq.reshape(B, Cin).sum(axis=0)
        n_bn = float(B * HW)
        cmean = csum / n_bn
        var_b = jnp.maximum(csq / n_bn - cmean * cmean, 0.0)
        inv_b = lax.rsqrt(var_b + EPS)
        bn_a = inv_b.reshape(Cin, 1)
        bn_b = (-cmean * inv_b).reshape(Cin, 1)

    kernel = _make_fused_kernel(ksize=ksize, pad=pad, H=H, W=W, cin=Cin,
                                cout=Cout, pad_l=pad_l, width=width,
                                first=first, conv_dtype=conv_dtype)
    kdim = K if first else 2 * K
    dt_bytes = 2 if conv_dtype == jnp.bfloat16 else 4

    shared_specs = [
        pl.BlockSpec((2 * Cout, kdim), lambda b: (0, 0)),        # w_cat
        pl.BlockSpec((2 * Cout, 1), lambda b: (0, 0)),           # b12
        pl.BlockSpec((kk, HW), lambda b: (0, 0)),                # masks
        pl.BlockSpec((HW, in_ch), lambda b: (0, 0)),             # pmat_big
        pl.BlockSpec((Cout, in_ch), lambda b: (0, 0)),           # sel_mask
        pl.BlockSpec((in_ch, HW), lambda b: (0, 0)),             # umat_big
        pl.BlockSpec((in_ch, hidden), lambda b: (0, 0)),         # wfc_T
        pl.BlockSpec((hidden, in_ch), lambda b: (0, 0)),         # wa1_T
        pl.BlockSpec((1, in_ch), lambda b: (0, 0)),              # ba1
        pl.BlockSpec((hidden, in_ch), lambda b: (0, 0)),         # wa2_T
        pl.BlockSpec((1, in_ch), lambda b: (0, 0)),              # ba2
    ]
    shared_args = [prepared["w_cat"], prepared["b12"], prepared["masks"],
                   prepared["pmat_big"], prepared["sel_mask"],
                   prepared["umat_big"], prepared["wfc_T"], prepared["wa1_T"],
                   prepared["ba1"], prepared["wa2_T"], prepared["ba2"]]

    if first:
        in_specs = [pl.BlockSpec((None, Cin, HW), lambda b: (b, 0, 0))] + shared_specs
        args = [x3] + shared_args
        scratch = [pltpu.VMEM((Cin, width), jnp.float32),
                   pltpu.VMEM((kdim, HW), conv_dtype)]
    else:
        in_specs = [pl.BlockSpec((None, Cin, HW), lambda b: (b, 0, 0)),
                    pl.BlockSpec((Cin, 1), lambda b: (0, 0)),
                    pl.BlockSpec((Cin, 1), lambda b: (0, 0)),
                    pl.BlockSpec((None, Cin, 1), lambda b: (b, 0, 0)),
                    pl.BlockSpec((None, Cin, 1), lambda b: (b, 0, 0))] + shared_specs
        args = [x3, bn_a, bn_b, in_a, in_b] + shared_args
        scratch = [pltpu.VMEM((Cin, width), jnp.float32),
                   pltpu.VMEM((Cin, width), jnp.float32),
                   pltpu.VMEM((kdim, HW), conv_dtype)]

    # Explicit scoped-VMEM budget (generous; v5e default is only 16 MiB).
    est = (2 * (Cin * HW * 4 + Cout * HW * 4)
           + 2 * sum(int(np.prod(a.shape)) * a.dtype.itemsize for a in shared_args)
           + (1 if first else 2) * Cin * width * 4
           + kdim * HW * dt_bytes
           + (4 << 20))
    vmem_limit = int(min(max(est, 32 << 20), 64 << 20))

    out = pl.pallas_call(
        kernel,
        out_shape=jax.ShapeDtypeStruct((B, Cout, HW), jnp.float32),
        grid=(B,),
        in_specs=in_specs,
        out_specs=pl.BlockSpec((None, Cout, HW), lambda b: (b, 0, 0)),
        scratch_shapes=scratch,
        compiler_params=pltpu.CompilerParams(
            dimension_semantics=("parallel",),
            vmem_limit_bytes=vmem_limit),
    )(*args)

    return out.reshape(B, Cout, H, W)


# ---------------------------------------------------------------------------
# Pure-JAX reference (mirrors the PyTorch forward) for validation
# ---------------------------------------------------------------------------
def reference_forward(x, params, *, ksize, pad, first=False):
    if first:
        f_in, s_in = x, x
    else:
        mean = x.mean(axis=(0, 2, 3), keepdims=True)
        var = ((x - mean) ** 2).mean(axis=(0, 2, 3), keepdims=True)
        f_in = (x - mean) / jnp.sqrt(var + EPS)
        f_in = jnp.where(f_in > 0, f_in, NEG_SLOPE * f_in)
        mi = x.mean(axis=(2, 3), keepdims=True)
        vi = ((x - mi) ** 2).mean(axis=(2, 3), keepdims=True)
        s_in = (x - mi) / jnp.sqrt(vi + EPS)
        s_in = jnp.where(s_in > 0, s_in, NEG_SLOPE * s_in)
    dn = ('NCHW', 'OIHW', 'NCHW')
    out1 = lax.conv_general_dilated(f_in, params["w1"], (1, 1),
                                    [(pad, pad), (pad, pad)],
                                    dimension_numbers=dn) + params["b1"][None, :, None, None]
    out2 = lax.conv_general_dilated(s_in, params["w2"], (1, 1),
                                    [(pad, pad), (pad, pad)],
                                    dimension_numbers=dn) + params["b2"][None, :, None, None]
    out = out1 + out2
    B, C, H, W = out.shape
    pooled = out.reshape(B, C, SP, H // SP, SP, W // SP).mean(axis=(3, 5))
    y = pooled.reshape(B, -1)
    y = jnp.maximum(y @ params["w_fc"].T, 0.0)
    a1 = y @ params["w_a1"].T + params["b_a1"]
    a2 = y @ params["w_a2"].T + params["b_a2"]
    att = jax.nn.softmax(jnp.stack([a1, a2]), axis=0)
    att1 = jnp.repeat(jnp.repeat(att[0].reshape(B, C, SP, SP), H // SP, axis=2), W // SP, axis=3)
    att2 = jnp.repeat(jnp.repeat(att[1].reshape(B, C, SP, SP), H // SP, axis=2), W // SP, axis=3)
    return out1 * att1 + out2 * att2


if __name__ == "__main__":
    # SelectiveConv(kernel_size=3, padding=1, bias=True, reduction=16,
    #               in_channels=4, out_channels=4, first=False)
    B, Cin, Cout, H, W = 2, 4, 4, 16, 16
    ksize, pad, reduction = 3, 1, 16
    in_channel = Cout * SP * SP          # Selector.in_channel = 64
    hidden = in_channel // reduction     # 4

    keys = jax.random.split(jax.random.PRNGKey(0), 10)
    params = {
        "w1":   jax.random.normal(keys[0], (Cout, Cin, ksize, ksize), jnp.float32) * 0.1,
        "b1":   jax.random.normal(keys[1], (Cout,), jnp.float32) * 0.1,
        "w2":   jax.random.normal(keys[2], (Cout, Cin, ksize, ksize), jnp.float32) * 0.1,
        "b2":   jax.random.normal(keys[3], (Cout,), jnp.float32) * 0.1,
        "w_fc": jax.random.normal(keys[4], (hidden, in_channel), jnp.float32) * 0.1,
        "w_a1": jax.random.normal(keys[5], (in_channel, hidden), jnp.float32) * 0.1,
        "b_a1": jax.random.normal(keys[6], (in_channel,), jnp.float32) * 0.1,
        "w_a2": jax.random.normal(keys[7], (in_channel, hidden), jnp.float32) * 0.1,
        "b_a2": jax.random.normal(keys[8], (in_channel,), jnp.float32) * 0.1,
    }
    x = jax.random.normal(keys[9], (B, Cin, H, W), jnp.float32)

    # One-time parameter preparation (hoisted off the forward's critical path).
    prep = prepare_selective_conv_params(params, ksize=ksize, pad=pad,
                                         H=H, W=W, first=False)
    prep_first = prepare_selective_conv_params(params, ksize=ksize, pad=pad,
                                               H=H, W=W, first=True)

    out = selective_conv_forward(x, params, ksize=ksize, pad=pad, first=False,
                                 prepared=prep)
    out = jax.block_until_ready(out)
    ref = reference_forward(x, params, ksize=ksize, pad=pad, first=False)
    np.testing.assert_allclose(np.asarray(out), np.asarray(ref), rtol=5e-2, atol=5e-2)

    out_f = selective_conv_forward(x, params, ksize=ksize, pad=pad, first=True,
                                   prepared=prep_first)
    out_f = jax.block_until_ready(out_f)
    ref_f = reference_forward(x, params, ksize=ksize, pad=pad, first=True)
    np.testing.assert_allclose(np.asarray(out_f), np.asarray(ref_f), rtol=5e-2, atol=5e-2)

    print("KERNEL_OK")
</pallas_src>

<mosaic_0001>
module attributes {stable_mosaic.version = 11 : i64} {
  func.func @_stats_kernel(%arg0: i32, %arg1: memref<8x256xf32, #tpu.memory_space<vmem>>, %arg2: memref<8x1xf32, #tpu.memory_space<vmem>>, %arg3: memref<8x1xf32, #tpu.memory_space<vmem>>) attributes {dimension_semantics = [#tpu.dimension_semantics<arbitrary>], iteration_bounds = array<i64: 1>, scalar_prefetch = 0 : i64, scratch_operands = 0 : i64, tpu.core_type = #tpu.core_type<tc>, window_params = [{transform_indices = @transform_0, window_bounds = array<i64: 8, 256>}, {pipeline_mode = #tpu.pipeline_mode<synchronous>, transform_indices = @transform_1, window_bounds = array<i64: 8, 1>}, {pipeline_mode = #tpu.pipeline_mode<synchronous>, transform_indices = @transform_2, window_bounds = array<i64: 8, 1>}]} {
    %c0_i32 = arith.constant 0 : i32
    %0 = arith.cmpi eq, %arg0, %c0_i32 : i32
    %1 = arith.extui %0 : i1 to i32
    %c0_i32_0 = arith.constant 0 : i32
    %2 = arith.cmpi ne, %1, %c0_i32_0 : i32
    scf.if %2 {
      %cst_11 = arith.constant 0.000000e+00 : f32
      %15 = vector.broadcast %cst_11 : f32 to vector<8x1xf32>
      %c0_12 = arith.constant 0 : index
      %c0_13 = arith.constant 0 : index
      %16 = vector.load %arg2[%c0_12, %c0_13] : memref<8x1xf32, #tpu.memory_space<vmem>>, vector<8x1xf32>
      tpu.vector_store %arg2[%c0_12, %c0_13], %15 {strides = array<i32>} : memref<8x1xf32, #tpu.memory_space<vmem>>, vector<8x1xf32>,
      %cst_14 = arith.constant 0.000000e+00 : f32
      %17 = vector.broadcast %cst_14 : f32 to vector<8x1xf32>
      %c0_15 = arith.constant 0 : index
      %c0_16 = arith.constant 0 : index
      %18 = vector.load %arg3[%c0_15, %c0_16] : memref<8x1xf32, #tpu.memory_space<vmem>>, vector<8x1xf32>
      tpu.vector_store %arg3[%c0_15, %c0_16], %17 {strides = array<i32>} : memref<8x1xf32, #tpu.memory_space<vmem>>, vector<8x1xf32>,
    } else {
    }
    %c0 = arith.constant 0 : index
    %c0_1 = arith.constant 0 : index
    %3 = vector.load %arg1[%c0, %c0_1] : memref<8x256xf32, #tpu.memory_space<vmem>>, vector<8x256xf32>
    %c0_2 = arith.constant 0 : index
    %c0_3 = arith.constant 0 : index
    %4 = vector.load %arg2[%c0_2, %c0_3] : memref<8x1xf32, #tpu.memory_space<vmem>>, vector<8x1xf32>
    %cst = arith.constant dense<0.000000e+00> : vector<8xf32>
    %5 = vector.multi_reduction <add>, %3, %cst [1] : vector<8x256xf32> to vector<8xf32>
    %6 = vector.shape_cast %5 : vector<8xf32> to vector<8x1xf32>
    %7 = arith.addf %4, %6 : vector<8x1xf32>
    %c0_4 = arith.constant 0 : index
    %c0_5 = arith.constant 0 : index
    %8 = vector.load %arg2[%c0_4, %c0_5] : memref<8x1xf32, #tpu.memory_space<vmem>>, vector<8x1xf32>
    tpu.vector_store %arg2[%c0_4, %c0_5], %7 {strides = array<i32>} : memref<8x1xf32, #tpu.memory_space<vmem>>, vector<8x1xf32>,
    %c0_6 = arith.constant 0 : index
    %c0_7 = arith.constant 0 : index
    %9 = vector.load %arg3[%c0_6, %c0_7] : memref<8x1xf32, #tpu.memory_space<vmem>>, vector<8x1xf32>
    %10 = arith.mulf %3, %3 : vector<8x256xf32>
    %cst_8 = arith.constant dense<0.000000e+00> : vector<8xf32>
    %11 = vector.multi_reduction <add>, %10, %cst_8 [1] : vector<8x256xf32> to vector<8xf32>
    %12 = vector.shape_cast %11 : vector<8xf32> to vector<8x1xf32>
    %13 = arith.addf %9, %12 : vector<8x1xf32>
    %c0_9 = arith.constant 0 : index
    %c0_10 = arith.constant 0 : index
    %14 = vector.load %arg3[%c0_9, %c0_10] : memref<8x1xf32, #tpu.memory_space<vmem>>, vector<8x1xf32>
    tpu.vector_store %arg3[%c0_9, %c0_10], %13 {strides = array<i32>} : memref<8x1xf32, #tpu.memory_space<vmem>>, vector<8x1xf32>,
    return
  }
  func.func @transform_0(%arg0: i32) -> (i32, i32) {
    %c0_i32 = arith.constant 0 : i32
    %c0_i32_0 = arith.constant 0 : i32
    return %c0_i32, %arg0 : i32, i32
  }
  func.func @transform_1(%arg0: i32) -> (i32, i32) {
    %c0_i32 = arith.constant 0 : i32
    %c0_i32_0 = arith.constant 0 : i32
    %c0_i32_1 = arith.constant 0 : i32
    return %c0_i32, %c0_i32_0 : i32, i32
  }
  func.func @transform_2(%arg0: i32) -> (i32, i32) {
    %c0_i32 = arith.constant 0 : i32
    %c0_i32_0 = arith.constant 0 : i32
    %c0_i32_1 = arith.constant 0 : i32
    return %c0_i32, %c0_i32_0 : i32, i32
  }
}

</mosaic_0001>

<bundles_post_ra>
// kernel: tpu_custom_call.1
= control target key start
LH: loop header
LB: loop body
LE: loop exit
PB: predicated region body
PF: predicated region fallthrough
CT: control target
= control target key end

     0   :  { %8 = vsyncpa [#allocation3], 0  ;;  %s81_s9 = smov [#allocation2]   ;;  %s132_s0 = inlined_call_operand.hbm [shape: f32[8,256], index: 0, kind: input, shape index: {}]   ;;  %s133_s1 = inlined_call_operand.vmem [shape: f32[8,1], index: 1, kind: output, shape index: {0}]   ;;  %s134_s2 = inlined_call_operand.vmem [shape: f32[8,1], index: 2, kind: output, shape index: {1}]  }
   0x1   :  { %s15_s10 = sshll.u32 %s81_s9, 4  ;;  %s57_s13 = scalar_lea.hbm %s132_s0, 256  ;;  %s16_s10 = int_to_ptr.vmem [resolvable:$true] %s15_s10 }
   0x2   :  { %p58_p0 = scmp.ne.s32.totalorder %s132_s0, %s57_s13  ;;  %p61_p1 = scmp.lt.u32.totalorder %s57_s13, %s132_s0 }
   0x4   :  { %p63_p2 = pnand %p61_p1, %p58_p0 }
   0x6   :  { %66 = shalt.err (!%p63_p2)
}
   0x7   :  { %s67_s18 = scalar_lea.vmem %s16_s10, 256  ;;  %p72_p4 = scmp.lt.s32.totalorder %s16_s10, %s16_s10 }
   0x8   :  { %p68_p3 = scmp.ne.s32.totalorder %s16_s10, %s67_s18  ;;  %p73_p5 = scmp.lt.s32.totalorder %s67_s18, %s67_s18 }
   0xa   :  { %p74_p6 = por %p73_p5, %p72_p4 }
   0xc   :  { %p75_p7 = pnand %p74_p6, %p68_p3 }
   0xe   :  { %78 = shalt.err (!%p75_p7)
}
   0xf   :  { %18 = dma.hbm_to_vmem [thread:$0]  %s132_s0, 256, %s16_s10, [#allocation3]  }
  0x10   :  { %79 = dma.done.wait [#allocation3], 256  }
  0x11   :  { %80 = vsyncadd [#allocation3], 4294967040  ;;  %vm26_vm0 = vcmask 7168   ;;  %v82_v0 = vmov 0.0   ;;  %v29_v1 = vld [vmem:[#allocation2] sm:$0xff]  ;;  %v30_v2 = vld [vmem:[#allocation2 + $0x8] sm:$0xff] }
  0x12   :  { %27 = vst.msk [vmem:[%s133_s1] sm:$0xff] %vm26_vm0, %v82_v0  ;;  %28 = vst.msk [vmem:[%s134_s2] sm:$0xff] %vm26_vm0, %v82_v0  ;;  %v32_v3 = vadd.f32 %v30_v2, %v29_v1  ;;  %v39_v4 = vmul.f32 %v29_v1, %v29_v1  ;;  %v40_v5 = vmul.f32 %v30_v2, %v30_v2 }
  0x14   :  { %33 = vadd.xlane.f32.xlu0 %v32_v3  ;;  %v41_v6 = vadd.f32 %v40_v5, %v39_v4 }
  0x18   :  { %42 = vadd.xlane.f32.xlu0 %v41_v6 }
  0x19   :  { %v31_v7 = vld [vmem:[%s133_s1] sm:$0xff] }
  0x1a   :  { %v38_v10 = vld [vmem:[%s134_s2] sm:$0xff] }
  0xa1   :  { %v34_v8 = vpop.xlane.xlu0 %33 }
  0xa2   :  { %v35_v9 = vadd.f32 %v34_v8, %v31_v7 }
  0xa4   :  { %37 = vst.msk [vmem:[%s133_s1] sm:$0xff] %vm26_vm0, %v35_v9 }
  0xa5   :  { %v43_v11 = vpop.xlane.xlu0 %42 }
  0xa6   :  { %v44_v12 = vadd.f32 %v43_v11, %v38_v10 }
  0xa8   :  { %45 = vst.msk [vmem:[%s134_s2] sm:$0xff] %vm26_vm0, %v44_v12 }
  0xa9   :  { %54 = vsyncpa [#allocation3], 1 }

</bundles_post_ra>
